<compile_context>
chip_gen: v6e
topology: v6e:2x2x1
jax: 0.10.0
libtpu: 0.0.40
codegen_flags: <defaults>
</compile_context>

<pallas_src>
import numpy as np

import jax
import jax.numpy as jnp
from jax.experimental import pallas as pl
from jax.experimental.pallas import tpu as pltpu

BLOCK_SIZE = 4      # causal-mask (max seq) size from the reference
N_EMBD = 32
HEAD_SIZE = 32      # bigram.py's single-head model uses Head(n_embd)


def head_kernel(x_ref, w_ref, bias_ref, o_ref):
    """x_ref: (B*T, C); w_ref: (3, C, hs) with the attention scale pre-folded into w_ref[0];
    bias_ref: (B*T, B*T) additive block-diagonal causal bias (0 / -1e30); o_ref: (B*T, hs)."""
    x = x_ref[...]                                                     # (B*T, C) float32

    # Three small MXU pushes (scale already folded into the query weight at init time).
    q = jnp.dot(x, w_ref[0], preferred_element_type=jnp.float32)      # (B*T, hs)
    k = jnp.dot(x, w_ref[1], preferred_element_type=jnp.float32)      # (B*T, hs)
    v = jnp.dot(x, w_ref[2], preferred_element_type=jnp.float32)      # (B*T, hs)

    # q @ k^T without materializing a transpose: contract dim 1 of both operands.
    wei = jax.lax.dot_general(
        q, k, dimension_numbers=(((1,), (1,)), ((), ())),
        preferred_element_type=jnp.float32)                            # (B*T, B*T)

    # Static block-diagonal causal mask as a single additive vadd.
    wei = wei + bias_ref[...]

    # Softmax (diagonal is always unmasked -> finite row max -> no NaNs); exact normalization.
    wei = wei - jnp.max(wei, axis=-1, keepdims=True)
    e = jnp.exp(wei)
    p = e / jnp.sum(e, axis=-1, keepdims=True)
    # TODO(synk): attention-weight dropout (p=0.2) -> inference-mode identity.

    o_ref[...] = jnp.dot(p, v, preferred_element_type=jnp.float32)     # (B*T, hs)


def init_head_params(wq, wk, wv, *, batch, seq_len):
    """One-time parameter preparation (init time, NOT per forward call).

    wq/wk/wv are stored as (C, head_size) so y = x @ W (equivalent to torch's x @ W.T with
    torch's (out_features, in_features) storage).
    Returns:
      w_stacked: (3, C, hs) with the reference's C**-0.5 scale folded into the query weight.
      bias:      (B*T, B*T) float32 additive mask, 0 where attention is allowed
                 ((same batch) AND (causal)), -1e30 elsewhere.
    """
    C = wq.shape[0]
    scale = C ** -0.5   # reference scales by n_embd (C), NOT head_size -- intentional.
    w_stacked = jnp.stack([wq * scale, wk, wv], axis=0).astype(jnp.float32)

    n = batch * seq_len
    row = np.arange(n)[:, None]
    col = np.arange(n)[None, :]
    allowed = (row // seq_len == col // seq_len) & (row >= col)
    bias = np.where(allowed, 0.0, -1e30).astype(np.float32)
    return w_stacked, jnp.asarray(bias)


def head_forward(x, w_stacked, bias):
    """x: (B, T, C). Forward path: one free reshape + one pallas_call, nothing else."""
    B, T, C = x.shape
    hs = w_stacked.shape[-1]
    x2d = x.reshape(B * T, C)                        # row-major -> free reshape outside the kernel

    out = pl.pallas_call(
        head_kernel,
        out_shape=jax.ShapeDtypeStruct((B * T, hs), jnp.float32),
        # Single grid step: whole problem (< 20 KB) lives in VMEM; no pipelining needed.
        in_specs=[pl.BlockSpec(memory_space=pltpu.MemorySpace.VMEM),
                  pl.BlockSpec(memory_space=pltpu.MemorySpace.VMEM),
                  pl.BlockSpec(memory_space=pltpu.MemorySpace.VMEM)],
        out_specs=pl.BlockSpec(memory_space=pltpu.MemorySpace.VMEM),
    )(x2d, w_stacked, bias)
    return out.reshape(B, T, hs)


# ---------- pure-JAX reference (same math, for verification) ----------
def ref_head(x, wq, wk, wv):
    B, T, C = x.shape
    q = x @ wq
    k = x @ wk
    v = x @ wv
    wei = jnp.einsum("btd,bsd->bts", q, k) * C ** -0.5
    mask = jnp.tril(jnp.ones((T, T), dtype=bool))
    wei = jnp.where(mask, wei, -jnp.inf)
    wei = jax.nn.softmax(wei, axis=-1)
    return jnp.einsum("bts,bsd->btd", wei, v)


if __name__ == "__main__":
    key = jax.random.PRNGKey(0)
    kx, kq, kk, kv = jax.random.split(key, 4)
    B, T, C = 2, BLOCK_SIZE, N_EMBD                  # (2, 4, 32)
    x = jax.random.normal(kx, (B, T, C), dtype=jnp.float32)
    wq = jax.random.normal(kq, (C, HEAD_SIZE), dtype=jnp.float32) * 0.1
    wk = jax.random.normal(kk, (C, HEAD_SIZE), dtype=jnp.float32) * 0.1
    wv = jax.random.normal(kv, (C, HEAD_SIZE), dtype=jnp.float32) * 0.1

    # One-time init-side preparation (fused weights + static additive mask).
    w_stacked, bias = init_head_params(wq, wk, wv, batch=B, seq_len=T)

    out = jax.block_until_ready(head_forward(x, w_stacked, bias))
    ref = jax.block_until_ready(ref_head(x, wq, wk, wv))

    assert out.shape == (B, T, HEAD_SIZE)
    max_err = jnp.max(jnp.abs(out - ref))
    assert jnp.allclose(out, ref, atol=1e-5, rtol=1e-5), f"max abs err {max_err}"
    print("KERNEL_OK")
</pallas_src>

<mosaic_0001>
module attributes {stable_mosaic.version = 11 : i64} {
  func.func @head_kernel(%arg0: memref<8x32xf32, #tpu.memory_space<vmem>>, %arg1: memref<3x32x32xf32, #tpu.memory_space<vmem>>, %arg2: memref<8x8xf32, #tpu.memory_space<vmem>>, %arg3: memref<8x32xf32, #tpu.memory_space<vmem>>) attributes {dimension_semantics = [], scalar_prefetch = 0 : i64, scratch_operands = 0 : i64, tpu.core_type = #tpu.core_type<tc>} {
    %c0 = arith.constant 0 : index
    %c0_0 = arith.constant 0 : index
    %0 = vector.load %arg0[%c0, %c0_0] : memref<8x32xf32, #tpu.memory_space<vmem>>, vector<8x32xf32>
    %c0_1 = arith.constant 0 : index
    %c0_2 = arith.constant 0 : index
    %c0_3 = arith.constant 0 : index
    %1 = vector.load %arg1[%c0_1, %c0_2, %c0_3] : memref<3x32x32xf32, #tpu.memory_space<vmem>>, vector<1x32x32xf32>
    %2 = vector.shape_cast %1 : vector<1x32x32xf32> to vector<32x32xf32>
    %cst = arith.constant dense<0.000000e+00> : vector<8x32xf32>
    %3 = tpu.matmul %0, %2, %cst {dimension_numbers = #tpu.dot_dimension_numbers<[1], [0], [0], [1], [0, 0, 1, 1], [], []>} : vector<8x32xf32>, vector<32x32xf32>, vector<8x32xf32> -> vector<8x32xf32>
    %c1 = arith.constant 1 : index
    %c0_4 = arith.constant 0 : index
    %c0_5 = arith.constant 0 : index
    %4 = vector.load %arg1[%c1, %c0_4, %c0_5] : memref<3x32x32xf32, #tpu.memory_space<vmem>>, vector<1x32x32xf32>
    %5 = vector.shape_cast %4 : vector<1x32x32xf32> to vector<32x32xf32>
    %cst_6 = arith.constant dense<0.000000e+00> : vector<8x32xf32>
    %6 = tpu.matmul %0, %5, %cst_6 {dimension_numbers = #tpu.dot_dimension_numbers<[1], [0], [0], [1], [0, 0, 1, 1], [], []>} : vector<8x32xf32>, vector<32x32xf32>, vector<8x32xf32> -> vector<8x32xf32>
    %c2 = arith.constant 2 : index
    %c0_7 = arith.constant 0 : index
    %c0_8 = arith.constant 0 : index
    %7 = vector.load %arg1[%c2, %c0_7, %c0_8] : memref<3x32x32xf32, #tpu.memory_space<vmem>>, vector<1x32x32xf32>
    %8 = vector.shape_cast %7 : vector<1x32x32xf32> to vector<32x32xf32>
    %cst_9 = arith.constant dense<0.000000e+00> : vector<8x32xf32>
    %9 = tpu.matmul %0, %8, %cst_9 {dimension_numbers = #tpu.dot_dimension_numbers<[1], [0], [0], [1], [0, 0, 1, 1], [], []>} : vector<8x32xf32>, vector<32x32xf32>, vector<8x32xf32> -> vector<8x32xf32>
    %cst_10 = arith.constant dense<0.000000e+00> : vector<8x8xf32>
    %10 = tpu.matmul %3, %6, %cst_10 {dimension_numbers = #tpu.dot_dimension_numbers<[1], [1], [0], [0], [0, 0, 1, 0], [], []>} : vector<8x32xf32>, vector<8x32xf32>, vector<8x8xf32> -> vector<8x8xf32>
    %c0_11 = arith.constant 0 : index
    %c0_12 = arith.constant 0 : index
    %11 = vector.load %arg2[%c0_11, %c0_12] : memref<8x8xf32, #tpu.memory_space<vmem>>, vector<8x8xf32>
    %12 = arith.addf %10, %11 : vector<8x8xf32>
    %cst_13 = arith.constant dense<0xFF800000> : vector<8xf32>
    %13 = vector.multi_reduction <maximumf>, %12, %cst_13 [1] : vector<8x8xf32> to vector<8xf32>
    %14 = vector.shape_cast %13 : vector<8xf32> to vector<8x1xf32>
    %15 = vector.broadcast %14 : vector<8x1xf32> to vector<8x8xf32>
    %16 = arith.subf %12, %15 : vector<8x8xf32>
    %17 = math.exp %16 : vector<8x8xf32>
    %cst_14 = arith.constant dense<0.000000e+00> : vector<8xf32>
    %18 = vector.multi_reduction <add>, %17, %cst_14 [1] : vector<8x8xf32> to vector<8xf32>
    %19 = vector.shape_cast %18 : vector<8xf32> to vector<8x1xf32>
    %20 = vector.broadcast %19 : vector<8x1xf32> to vector<8x8xf32>
    %21 = arith.divf %17, %20 : vector<8x8xf32>
    %cst_15 = arith.constant dense<0.000000e+00> : vector<8x32xf32>
    %22 = tpu.matmul %21, %9, %cst_15 {dimension_numbers = #tpu.dot_dimension_numbers<[1], [0], [0], [1], [0, 0, 1, 1], [], []>} : vector<8x8xf32>, vector<8x32xf32>, vector<8x32xf32> -> vector<8x32xf32>
    %c0_16 = arith.constant 0 : index
    %c0_17 = arith.constant 0 : index
    %23 = vector.load %arg3[%c0_16, %c0_17] : memref<8x32xf32, #tpu.memory_space<vmem>>, vector<8x32xf32>
    tpu.vector_store %arg3[%c0_16, %c0_17], %22 {strides = array<i32>} : memref<8x32xf32, #tpu.memory_space<vmem>>, vector<8x32xf32>,
    return
  }
}

</mosaic_0001>

<bundles_post_ra>
// kernel: tpu_custom_call.1
= control target key start
LH: loop header
LB: loop body
LE: loop exit
PB: predicated region body
PF: predicated region fallthrough
CT: control target
= control target key end

     0   :  { %8 = vsyncpa [#allocation3], 0  ;;  %s680_s0 = inlined_call_operand.hbm [shape: f32[8,32], index: 0, kind: input, shape index: {}]   ;;  %s681_s1 = inlined_call_operand.hbm [shape: f32[3,32,32], index: 1, kind: input, shape index: {}]   ;;  %s682_s2 = inlined_call_operand.hbm [shape: f32[8,8], index: 2, kind: input, shape index: {}]   ;;  %s683_s3 = inlined_call_operand.hbm [shape: f32[8,32], index: 3, kind: output, shape index: {}]  }
   0x1   :  { %9 = vsyncpa [#allocation6], 0 }
   0x2   :  { %10 = vsyncpa [#allocation4], 0  ;;  %s626_s12 = smov [#allocation5]  }
   0x3   :  { %s26_s13 = sshll.u32 %s626_s12, 4  ;;  %s27_s13 = int_to_ptr.vmem [resolvable:$true] %s26_s13 }
   0x4   :  { %s548_s14 = scalar_lea.vmem %s27_s13, 1536  ;;  %p553_p1 = scmp.lt.s32.totalorder %s27_s13, %s27_s13 }
   0x5   :  { %p549_p0 = scmp.ne.s32.totalorder %s27_s13, %s548_s14  ;;  %p554_p2 = scmp.lt.s32.totalorder %s548_s14, %s548_s14 }
   0x7   :  { %p555_p3 = por %p554_p2, %p553_p1 }
   0x9   :  { %p556_p4 = pnand %p555_p3, %p549_p0 }
   0xb   :  { %559 = shalt.err (!%p556_p4)
}
   0xc   :  { %s627_s15 = smov 128   ;;  %s628_s16 = smov 8  }
   0xd   :  { %32 = dma.hbm_to_vmem [thread:$0]  %s681_s1, 1536, %s27_s13, [#allocation6], %s627_s15, %s627_s15, %s628_s16  }
   0xe   :  { %s629_s19 = smov [#allocation2]   ;;  %s630_s21 = smov [#allocation7]  }
   0xf   :  { %s17_s20 = sshll.u32 %s629_s19, 4  ;;  %s39_s22 = sshll.u32 %s630_s21, 4  ;;  %s18_s20 = int_to_ptr.vmem [resolvable:$true] %s17_s20  ;;  %s40_s22 = int_to_ptr.vmem [resolvable:$true] %s39_s22 }
  0x10   :  { %s568_s23 = scalar_lea.vmem %s18_s20, 128  ;;  %p573_p6 = scmp.lt.s32.totalorder %s18_s20, %s18_s20 }
  0x11   :  { %p569_p5 = scmp.ne.s32.totalorder %s18_s20, %s568_s23  ;;  %p574_p7 = scmp.lt.s32.totalorder %s568_s23, %s568_s23 }
  0x13   :  { %p575_p8 = por %p574_p7, %p573_p6 }
  0x15   :  { %p576_p9 = pnand %p575_p8, %p569_p5 }
  0x17   :  { %579 = shalt.err (!%p576_p9)
}
  0x18   :  { %20 = dma.hbm_to_vmem [thread:$0]  %s680_s0, 128, %s18_s20, [#allocation3]  }
  0x19   :  { %s588_s26 = scalar_lea.vmem %s40_s22, 128  ;;  %p593_p11 = scmp.lt.s32.totalorder %s40_s22, %s40_s22 }
  0x1a   :  { %p589_p10 = scmp.ne.s32.totalorder %s40_s22, %s588_s26  ;;  %p594_p12 = scmp.lt.s32.totalorder %s588_s26, %s588_s26 }
  0x1c   :  { %p595_p13 = por %p594_p12, %p593_p11 }
  0x1e   :  { %p596_p0 = pnand %p595_p13, %p589_p10 }
  0x20   :  { %599 = shalt.err (!%p596_p0)
}
  0x21   :  { %42 = dma.hbm_to_vmem [thread:$0]  %s682_s2, 128, %s40_s22, [#allocation6]  }
  0x22   :  { %620 = dma.done.wait [#allocation3], 128  }
  0x23   :  { %621 = vsyncadd [#allocation3], 4294967168 }
  0x24   :  { %622 = dma.done.wait [#allocation6], 1664  }
  0x25   :  { %623 = vsyncadd [#allocation6], 4294965632  ;;  %v631_v0 = vmov 0.0   ;;  %vm632_vm0 = vmmov 0   ;;  %v135_v1 = vld [vmem:[#allocation5 + $0x38] sm:$0xff]  ;;  %v134_v3 = vld [vmem:[#allocation5 + $0x30] sm:$0xff] }
  0x26   :  { %496 = vmatprep.subr.mxu1 %v631_v0  ;;  %485 = vmatprep.subr.mxu0 %v631_v0  ;;  %v56_v2 = vld [vmem:[#allocation5 + $0x18] sm:$0xff]  ;;  %v55_v4 = vld [vmem:[#allocation5 + $0x10] sm:$0xff]  ;;  %v133_v5 = vld [vmem:[#allocation5 + $0x28] sm:$0xff]  ;;  %vm57_vm1 = vcmask 261120   ;;  %vm358_vm2 = vcmask 64512   ;;  %s633_s0 = smov [#allocation8]  }
  0x27   :  { %504 = vmatprep.mubr.msk.f32.mxu1 %vm632_vm0, %v631_v0  ;;  %493 = vmatprep.mubr.msk.f32.mxu0 %vm632_vm0, %v631_v0  ;;  %v54_v6 = vld [vmem:[#allocation5 + $0x8] sm:$0xff]  ;;  %v132_v7 = vld [vmem:[#allocation5 + $0x20] sm:$0xff]  ;;  %v52_v9 = vld [vmem:[#allocation2] sm:$0xff]  ;;  %s450_s2 = sshll.u32 %s633_s0, 4  ;;  %s451_s2 = int_to_ptr.vmem [resolvable:$true] %s450_s2 }
  0x28   :  { %497 = vmatpush3.msra.mxu1 %v135_v1  ;;  %486 = vmatpush3.msra.mxu0 %v56_v2  ;;  %v53_v8 = vld [vmem:[#allocation5] sm:$0xff]  ;;  %v210_v14 = vld [vmem:[#allocation5 + $0x58] sm:$0xff]  ;;  %v209_v15 = vld [vmem:[#allocation5 + $0x50] sm:$0xff]  ;;  %s600_s28 = scalar_lea.vmem %s451_s2, 128  ;;  %p605_p2 = scmp.lt.s32.totalorder %s451_s2, %s451_s2 }
  0x29   :  { %498 = vmatprep.subr.mxu1 %v631_v0  ;;  %487 = vmatprep.subr.mxu0 %v631_v0  ;;  %v208_v16 = vld [vmem:[#allocation5 + $0x48] sm:$0xff]  ;;  %v207_v17 = vld [vmem:[#allocation5 + $0x40] sm:$0xff]  ;;  %p601_p1 = scmp.ne.s32.totalorder %s451_s2, %s600_s28  ;;  %p606_p3 = scmp.lt.s32.totalorder %s600_s28, %s600_s28 }
  0x2a   :  { %499 = vmatpush3.msra.mxu1 %v134_v3  ;;  %488 = vmatpush3.msra.mxu0 %v55_v4  ;;  %v281_v18 = vld [vmem:[#allocation7] sm:$0xff] }
  0x2b   :  { %500 = vmatprep.subr.mxu1 %v631_v0  ;;  %489 = vmatprep.subr.mxu0 %v631_v0  ;;  %p607_p4 = por %p606_p3, %p605_p2 }
  0x2c   :  { %501 = vmatpush3.msra.mxu1 %v133_v5  ;;  %490 = vmatpush3.msra.mxu0 %v54_v6 }
  0x2d   :  { %502 = vmatprep.subr.mxu1 %v631_v0  ;;  %491 = vmatprep.subr.mxu0 %v631_v0  ;;  %p608_p5 = pnand %p607_p4, %p601_p1 }
  0x2e   :  { %503 = vmatpush3.msra.mxu1 %v132_v7  ;;  %492 = vmatpush3.msra.mxu0 %v53_v8 }
  0x2f   :  { %505 = vmatmul.mubr.msk.f32.vlgmr.msra.gmra.mxu1 %vm57_vm1, %v52_v9  ;;  %494 = vmatmul.mubr.msk.f32.vlgmr.msra.gmra.mxu0 %vm57_vm1, %v52_v9 }
  0x30   :  { %518 = vmatprep.subr.mxu1 %v631_v0  ;;  %520 = vmatprep.mubr.msk.f32.mxu1 %vm632_vm0, %v631_v0 }
  0x31   :  { %507 = vmatprep.subr.mxu0 %v631_v0  ;;  %515 = vmatprep.mubr.msk.f32.mxu0 %vm632_vm0, %v631_v0 }
  0x32   :  { %508 = vmatpush3.msra.mxu0 %v210_v14 }
  0x33   :  { %509 = vmatprep.subr.mxu0 %v631_v0 }
  0x34   :  { %510 = vmatpush3.msra.mxu0 %v209_v15 }
  0x35   :  { %511 = vmatprep.subr.mxu0 %v631_v0 }
  0x36   :  { %512 = vmatpush3.msra.mxu0 %v208_v16 }
  0x37   :  { %513 = vmatprep.subr.mxu0 %v631_v0 }
  0x38   :  { %514 = vmatpush3.msra.mxu0 %v207_v17 }
  0x39   :  { %516 = vmatmul.mubr.msk.f32.vlgmr.msra.gmra.mxu0 %vm57_vm1, %v52_v9 }
  0xef   :  { %v202_v10 = vpop.f32.mrf.mxu1  ;;  %v127_v11 = vpop.f32.mrf.mxu0 }
  0xf0   :  { %519 = vmatpush3.xpose.msk.msra.mxu1 %vm57_vm1, %v202_v10 }
  0xf1   :  { %v506_v12 = vpop.f32.mrf.mxu1  ;;  %v495_v13 = vpop.f32.mrf.mxu0  ;;  %523 = vmatprep.subr.mxu1 %v631_v0 }
  0xf3   :  { %521 = vmatmul.mubr.msk.f32.vlgmr.msra.gmra.mxu1 %vm57_vm1, %v127_v11 }
  0xf4   :  { %525 = vmatprep.mubr.msk.f32.mxu1 %vm632_vm0, %v631_v0 }
  0xf9   :  { %v277_v28 = vpop.f32.mrf.mxu0 }
  0xfa   :  { %524 = vmatpush3.msra.mxu1 %v277_v28 }
  0xfb   :  { %v517_v29 = vpop.f32.mrf.mxu0 }
 0x1b3   :  { %v354_v19 = vpop.f32.mrf.mxu1 }
 0x1b4   :  { %v355_v20 = vadd.f32 %v354_v19, %v281_v18 }
 0x1b5   :  { %v522_v21 = vpop.f32.mrf.mxu1 }
 0x1b6   :  { %v359_v22 = vsel %vm358_vm2, %v355_v20, -inf }
 0x1b7   :  { %360 = vmax.xlane.f32.xlu0 %v359_v22 }
 0x240   :  { %v361_v23 = vpop.xlane.xlu0 %360 }
 0x241   :  { %v362_v24 = vsub.f32 %v355_v20, %v361_v23 }
 0x243   :  { %v363_v25 = vmul.f32 1.442695, %v362_v24 }
 0x245   :  { %536 = vpow2.f32 %v363_v25 }
 0x252   :  { %v537_v26 = vpop.eup %536 }
 0x253   :  { %v365_v27 = vsel %vm358_vm2, %v537_v26, 0.0 }
 0x254   :  { %366 = vadd.xlane.f32.xlu0 %v365_v27 }
 0x2dd   :  { %v367_v30 = vpop.xlane.xlu0 %366 }
 0x2de   :  { %538 = vrcp.f32 %v367_v30 }
 0x2eb   :  { %v539_v31 = vpop.eup %538 }
 0x2ec   :  { %v369_v32 = vmul.f32 %v539_v31, %v537_v26 }
 0x2ee   :  { %526 = vmatmul.mubr.msk.f32.vlgmr.msra.gmra.mxu1 %vm358_vm2, %v369_v32 }
 0x3ae   :  { %v439_v33 = vpop.f32.mrf.mxu1 }
 0x3af   :  { %443 = vst.msk [vmem:[#allocation8] sm:$0xff] %vm57_vm1, %v439_v33 }
 0x3b0   :  { %v527_v34 = vpop.f32.mrf.mxu1 }
 0x3b1   :  { %611 = shalt.err (!%p608_p5)
}
 0x3b2   :  { %453 = dma.vmem_to_hbm [thread:$0]  %s451_s2, 128, %s683_s3, [#allocation4]  }
 0x3b3   :  { %624 = dma.done.wait [#allocation4], 128  }
 0x3b4   :  { %625 = vsyncadd [#allocation4], 4294967168 }
 0x3b5   :  { %457 = vsyncpa [#allocation3], 1 }
 0x3b6   :  { %458 = vsyncpa [#allocation6], 1 }
 0x3b7   :  { %459 = vsyncpa [#allocation4], 1 }

</bundles_post_ra>
